<compile_context>
chip_gen: v6e
topology: v6e:2x2x1
jax: 0.10.0
libtpu: 0.0.40
codegen_flags: <defaults>
</compile_context>

<pallas_src>
import jax
import jax.numpy as jnp
import numpy as np
from jax import lax
from jax.experimental import pallas as pl
from jax.experimental.pallas import tpu as pltpu

LOSS_BOOSTING_COEFF = 10000.0


def _make_partials_kernel(tile, k_steps, num_rows, q, needs_mask):
    """Streaming reduction: per-core [SSE, z_discrim, z_style] lane partials."""

    def kernel(x_ref, t_ref, w_ref, sel_ref, out_ref):
        c = pl.program_id(0)          # TensorCore / outer split
        k = pl.program_id(1)          # row-tile step (reduction axis)

        @pl.when(k == 0)
        def _init():
            out_ref[...] = jnp.zeros_like(out_ref)

        x = x_ref[...].astype(jnp.float32)       # (tile, 128) lane-dense
        t = t_ref[...].astype(jnp.float32)

        if needs_mask:
            # Zero rows past the end of the (un-padded) activation slab.  The
            # mask uses the true global row (from program ids), not the
            # clamped block index, so fully-out-of-range steps contribute 0.
            row0 = (c * k_steps + k) * tile
            rows = row0 + lax.broadcasted_iota(jnp.int32, (tile, 1), 0)
            valid = rows < num_rows
            x = jnp.where(valid, x, 0.0)
            t = jnp.where(valid, t, 0.0)

        # ---- MSE partial (VPU stream): per-lane sum of squared diffs --------
        d = x - t
        out_ref[0:1, :] += jnp.sum(d * d, axis=0, keepdims=True)

        # ---- fused two-head contraction on the (otherwise idle) MXU ---------
        # g[h*q + j, l] = sum_r w_h[r*q + j] * x[r, l]; the constant sel mask
        # keeps only j == l // b, i.e. each lane's own within-row feature slot.
        g = jnp.dot(w_ref[...], x.astype(jnp.bfloat16),
                    preferred_element_type=jnp.float32)          # (2q, 128)
        gm = g * sel_ref[...]
        out_ref[1:2, :] += jnp.sum(gm[0:q, :], axis=0, keepdims=True)
        out_ref[2:3, :] += jnp.sum(gm[q:2 * q, :], axis=0, keepdims=True)

    return kernel


def _pick_tile(num_rows, q):
    """Device-aware row-tile: large enough to amortize per-step overhead,
    small enough for the scoped VMEM budget, <= ~half the rows (keeps both
    v7x TensorCores busy)."""
    try:
        kind = jax.devices()[0].device_kind.lower()
    except Exception:  # pragma: no cover
        kind = ""
    if "v5 lite" in kind or "v5e" in kind or "v5lite" in kind:
        cap, budget = 2048, 12 << 20      # v5e: 16 MiB default scoped VMEM
    else:
        cap, budget = 8192, 24 << 20      # v6e / v7x / v5p / v4
    # Bytes per streamed row, double-buffered: x + t in f32, fused weights bf16.
    per_row = 2 * (2 * 128 * 4 + 2 * q * 2)
    tile = max(128, min(cap, (budget // per_row) // 128 * 128))
    half = (((num_rows + 1) // 2) + 127) // 128 * 128
    return max(128, min(tile, half))


def npi_loss(predicted_activs, true_activs, target_label, w_discrim, w_style,
             *, discrim_coeff, style_coeff, similarity_coeff,
             bias_d=0.0, bias_s=0.0, tile_rows=None):
    """predicted_activs / true_activs: (n, m, 1, b); target_label: (b, 1, 2, 1)."""
    n, m, one, b = predicted_activs.shape
    F = n * m * one
    total = F * b

    if 128 % b != 0:
        # TODO(synk): general batch sizes need a different lane->batch folding.
        raise NotImplementedError("batch size must divide 128")
    q = 128 // b

    num_rows = -(-total // 128)
    tile = tile_rows if tile_rows is not None else _pick_tile(num_rows, q)
    tile = max(128, (tile // 128) * 128)          # weight block needs 128 | tile
    nblocks = -(-num_rows // tile)
    k_steps = -(-nblocks // 2)                    # reduction steps per core
    needs_mask = (2 * k_steps * tile != num_rows)

    # Lane-dense (num_rows, 128) view of the activations.  For total % 128 == 0
    # (the common case) this is a pure reshape: no HBM copy, no padding; the
    # ragged row tail is masked inside the kernel instead.
    def flatten(a):
        v = a.reshape(-1)
        if num_rows * 128 != total:
            # TODO(synk): rare path (total % 128 != 0) still costs one copy.
            v = jnp.pad(v, (0, num_rows * 128 - total))
        return v.reshape(num_rows, 128)

    x2 = flatten(predicted_activs)
    t2 = flatten(true_activs)

    # Fused head weights (2q, R) in bf16, zero-padded to the full grid extent
    # so ragged / clamped weight blocks never feed garbage into the dot.
    r_w = nblocks * tile
    f_pad = r_w * q

    def head(w):
        wf = w.reshape(-1).astype(jnp.float32)
        wf = jnp.pad(wf, (0, f_pad - F))
        return wf.reshape(r_w, q).T               # (q, R): [j, r] = w[r*q + j]

    w2 = jnp.concatenate([head(w_discrim), head(w_style)],
                         axis=0).astype(jnp.bfloat16)             # (2q, R)

    # Constant lane-selection mask, streamed once (constant index_map).
    j_idx = jnp.arange(q, dtype=jnp.int32).reshape(q, 1)
    l_idx = jnp.arange(128, dtype=jnp.int32).reshape(1, 128)
    sel_half = (l_idx // b == j_idx).astype(jnp.float32)          # (q, 128)
    sel = jnp.concatenate([sel_half, sel_half], axis=0)           # (2q, 128)

    def blk_idx(c, k):
        # Clamp so the last (possibly odd) block is never addressed past the
        # array; the in-kernel row mask zeroes any re-read data.
        return jnp.minimum(c * k_steps + k, nblocks - 1)

    kernel = _make_partials_kernel(tile, k_steps, num_rows, q, needs_mask)

    # Explicit scoped-VMEM budget: double-buffered x/t/w streams + bf16 temp.
    x_bytes = tile * 128 * 4
    w_bytes = 2 * q * tile * 2
    vmem_ws = 2 * (2 * x_bytes + w_bytes) + x_bytes // 2 + (2 << 20)
    vmem_limit = int(min(max(vmem_ws + (12 << 20), 32 << 20), 48 << 20))

    flops = 2 * (2 * q) * num_rows * 128 + 4 * num_rows * 128
    bytes_accessed = (2 * num_rows * 128 * 4 + 2 * q * r_w * 2
                      + 2 * q * 128 * 4 + 2 * 8 * 128 * 4)

    partials = pl.pallas_call(
        kernel,
        out_shape=jax.ShapeDtypeStruct((2, 8, 128), jnp.float32),
        grid=(2, k_steps),
        in_specs=[
            pl.BlockSpec((tile, 128), lambda c, k: (blk_idx(c, k), 0)),   # pred
            pl.BlockSpec((tile, 128), lambda c, k: (blk_idx(c, k), 0)),   # true
            pl.BlockSpec((2 * q, tile), lambda c, k: (0, blk_idx(c, k))), # weights
            pl.BlockSpec((2 * q, 128), lambda c, k: (0, 0)),              # sel mask
        ],
        out_specs=pl.BlockSpec((None, 8, 128), lambda c, k: (c, 0, 0)),
        compiler_params=pltpu.CompilerParams(
            dimension_semantics=("parallel", "arbitrary"),
            vmem_limit_bytes=vmem_limit),
        cost_estimate=pl.CostEstimate(flops=int(flops), transcendentals=0,
                                      bytes_accessed=int(bytes_accessed)),
    )(x2, t2, w2, sel)

    # ---- tiny epilogue in plain f32 JAX (no bf16 MXU lane-fold) -------------
    parts = jnp.sum(partials, axis=0)                             # (8, 128)
    sse = jnp.sum(parts[0])
    z_d = jnp.sum(parts[1].reshape(q, b), axis=0) + bias_d        # (b,)
    z_s = jnp.sum(parts[2].reshape(q, b), axis=0) + bias_s
    tgt = target_label.reshape(b, 2).astype(jnp.float32)

    def bce_from_logits(z, t):
        # torch BCELoss clamps each log term at -100  <=>  cap the NLL at 100.
        pos = jnp.minimum(jax.nn.softplus(-z), 100.0)   # -log(sigmoid(z))
        neg = jnp.minimum(jax.nn.softplus(z), 100.0)    # -log(1 - sigmoid(z))
        return jnp.mean(t * pos + (1.0 - t) * neg)

    new_discrim_score = discrim_coeff * bce_from_logits(z_d, tgt[:, 0])
    new_style_score = style_coeff * bce_from_logits(z_s, tgt[:, 1])
    old_content_score = similarity_coeff * (sse / total)
    return LOSS_BOOSTING_COEFF * (new_discrim_score + new_style_score
                                  + old_content_score)


def npi_loss_reference(predicted_activs, true_activs, target_label,
                       w_discrim, w_style, *, discrim_coeff, style_coeff,
                       similarity_coeff, bias_d=0.0, bias_s=0.0):
    """Pure-JAX f32 reference mirroring the torch forward (sigmoid + clamped-log BCE)."""
    n, m, one, b = predicted_activs.shape
    F = n * m * one
    pred = predicted_activs.reshape(F, b).astype(jnp.float32)
    true = true_activs.reshape(F, b).astype(jnp.float32)
    tgt = target_label.reshape(b, 2).astype(jnp.float32)

    w_d = w_discrim.reshape(F, 1).astype(jnp.float32)
    w_s = w_style.reshape(F, 1).astype(jnp.float32)
    z_d = jnp.sum(pred * w_d, axis=0) + bias_d                    # (b,) exact f32
    z_s = jnp.sum(pred * w_s, axis=0) + bias_s
    p_d = jax.nn.sigmoid(z_d)
    p_s = jax.nn.sigmoid(z_s)

    def bce(p, t):
        return jnp.mean(-(t * jnp.maximum(jnp.log(p), -100.0)
                          + (1.0 - t) * jnp.maximum(jnp.log(1.0 - p), -100.0)))

    d = discrim_coeff * bce(p_d, tgt[:, 0])
    s = style_coeff * bce(p_s, tgt[:, 1])
    c = similarity_coeff * jnp.mean((pred - true) ** 2)
    return LOSS_BOOSTING_COEFF * (d + s + c)


if __name__ == "__main__":
    key = jax.random.PRNGKey(0)
    coeffs = dict(discrim_coeff=3.0, style_coeff=10.0, similarity_coeff=1.0,
                  bias_d=0.1, bias_s=-0.1)

    # (n, m, b, tile_rows): small shapes consistent with the module's
    # (n, m, 1, b) activations.
    configs = [
        (128, 128, 4, 128),    # multi-step accumulation on both grid "cores"
        (96, 40, 4, 128),      # ragged row tail -> in-kernel masking + clamp
        (128, 128, 4, None),   # device-tuned tile (production path)
    ]

    for (n, m, b, tile_rows) in configs:
        k1, k2, k3, k4, k5, key = jax.random.split(key, 6)
        F = n * m
        predicted_activs = jax.random.normal(k1, (n, m, 1, b), dtype=jnp.float32)
        true_activs = predicted_activs + 0.1 * jax.random.normal(
            k2, (n, m, 1, b), dtype=jnp.float32)
        # target_label: (b, 1, 2, 1) — [:, :, 0, :] discrim, [:, :, 1, :] style.
        target_label = (jax.random.uniform(k3, (b, 1, 2, 1)) > 0.5).astype(
            jnp.float32)

        # TODO(synk): the discrim/style sub-models have no definition in the
        # spec; they are synthesized as deterministic linear + sigmoid heads.
        w_scale = 1.0 / np.sqrt(F)
        w_discrim = w_scale * jax.random.normal(k4, (F, 1), dtype=jnp.float32)
        w_style = w_scale * jax.random.normal(k5, (F, 1), dtype=jnp.float32)

        loss = npi_loss(predicted_activs, true_activs, target_label,
                        w_discrim, w_style, tile_rows=tile_rows, **coeffs)
        loss = jax.block_until_ready(loss)

        ref = npi_loss_reference(predicted_activs, true_activs, target_label,
                                 w_discrim, w_style, **coeffs)
        np.testing.assert_allclose(np.asarray(loss), np.asarray(ref),
                                   rtol=5e-3, atol=1.0)

    print("KERNEL_OK")
</pallas_src>

<mosaic_0001>
module attributes {stable_mosaic.version = 11 : i64} {
  func.func @kernel(%arg0: i32, %arg1: i32, %arg2: memref<128x128xf32, #tpu.memory_space<vmem>>, %arg3: memref<128x128xf32, #tpu.memory_space<vmem>>, %arg4: memref<64x128xbf16, #tpu.memory_space<vmem>>, %arg5: memref<64x128xf32, #tpu.memory_space<vmem>>, %arg6: memref<1x8x128xf32, #tpu.memory_space<vmem>>) attributes {dimension_semantics = [#tpu.dimension_semantics<parallel>, #tpu.dimension_semantics<arbitrary>], iteration_bounds = array<i64: 2, 2>, scalar_prefetch = 0 : i64, scratch_operands = 0 : i64, tpu.core_type = #tpu.core_type<tc>, window_params = [{transform_indices = @transform_0, window_bounds = array<i64: 128, 128>}, {transform_indices = @transform_1, window_bounds = array<i64: 128, 128>}, {transform_indices = @transform_2, window_bounds = array<i64: 64, 128>}, {pipeline_mode = #tpu.pipeline_mode<synchronous>, transform_indices = @transform_3, window_bounds = array<i64: 64, 128>}, {transform_indices = @transform_4, window_bounds = array<i64: 1, 8, 128>}]} {
    %c0_i32 = arith.constant 0 : i32
    %0 = arith.cmpi eq, %arg1, %c0_i32 : i32
    %1 = arith.extui %0 : i1 to i32
    %c0_i32_0 = arith.constant 0 : i32
    %2 = arith.cmpi ne, %1, %c0_i32_0 : i32
    scf.if %2 {
      %cst_27 = arith.constant 0.000000e+00 : f32
      %38 = vector.broadcast %cst_27 : f32 to vector<8x128xf32>
      %c0_28 = arith.constant 0 : index
      %c0_29 = arith.constant 0 : index
      %c0_30 = arith.constant 0 : index
      %39 = vector.load %arg6[%c0_28, %c0_29, %c0_30] : memref<1x8x128xf32, #tpu.memory_space<vmem>>, vector<1x8x128xf32>
      %40 = vector.shape_cast %39 : vector<1x8x128xf32> to vector<8x128xf32>
      %41 = vector.shape_cast %38 : vector<8x128xf32> to vector<1x8x128xf32>
      tpu.vector_store %arg6[%c0_28, %c0_29, %c0_30], %41 {strides = array<i32>} : memref<1x8x128xf32, #tpu.memory_space<vmem>>, vector<1x8x128xf32>,
    } else {
    }
    %c0 = arith.constant 0 : index
    %c0_1 = arith.constant 0 : index
    %3 = vector.load %arg2[%c0, %c0_1] : memref<128x128xf32, #tpu.memory_space<vmem>>, vector<128x128xf32>
    %c0_2 = arith.constant 0 : index
    %c0_3 = arith.constant 0 : index
    %4 = vector.load %arg3[%c0_2, %c0_3] : memref<128x128xf32, #tpu.memory_space<vmem>>, vector<128x128xf32>
    %5 = arith.subf %3, %4 : vector<128x128xf32>
    %c0_4 = arith.constant 0 : index
    %c0_5 = arith.constant 0 : index
    %c0_6 = arith.constant 0 : index
    %6 = vector.load %arg6[%c0_4, %c0_5, %c0_6] : memref<1x8x128xf32, #tpu.memory_space<vmem>>, vector<1x1x128xf32>
    %7 = vector.shape_cast %6 : vector<1x1x128xf32> to vector<1x128xf32>
    %8 = arith.mulf %5, %5 : vector<128x128xf32>
    %cst = arith.constant dense<0.000000e+00> : vector<128xf32>
    %9 = vector.multi_reduction <add>, %8, %cst [0] : vector<128x128xf32> to vector<128xf32>
    %10 = vector.shape_cast %9 : vector<128xf32> to vector<1x128xf32>
    %11 = arith.addf %7, %10 : vector<1x128xf32>
    %c0_7 = arith.constant 0 : index
    %c0_8 = arith.constant 0 : index
    %c0_9 = arith.constant 0 : index
    %12 = vector.load %arg6[%c0_7, %c0_8, %c0_9] : memref<1x8x128xf32, #tpu.memory_space<vmem>>, vector<1x1x128xf32>
    %13 = vector.shape_cast %12 : vector<1x1x128xf32> to vector<1x128xf32>
    %14 = vector.shape_cast %11 : vector<1x128xf32> to vector<1x1x128xf32>
    tpu.vector_store %arg6[%c0_7, %c0_8, %c0_9], %14 {strides = array<i32>} : memref<1x8x128xf32, #tpu.memory_space<vmem>>, vector<1x1x128xf32>,
    %c0_10 = arith.constant 0 : index
    %c0_11 = arith.constant 0 : index
    %15 = vector.load %arg4[%c0_10, %c0_11] : memref<64x128xbf16, #tpu.memory_space<vmem>>, vector<64x128xbf16>
    %16 = arith.truncf %3 : vector<128x128xf32> to vector<128x128xbf16>
    %cst_12 = arith.constant dense<0.000000e+00> : vector<64x128xf32>
    %17 = tpu.matmul %15, %16, %cst_12 {dimension_numbers = #tpu.dot_dimension_numbers<[1], [0], [0], [1], [0, 0, 1, 1], [], []>} : vector<64x128xbf16>, vector<128x128xbf16>, vector<64x128xf32> -> vector<64x128xf32>
    %c0_13 = arith.constant 0 : index
    %c0_14 = arith.constant 0 : index
    %18 = vector.load %arg5[%c0_13, %c0_14] : memref<64x128xf32, #tpu.memory_space<vmem>>, vector<64x128xf32>
    %19 = arith.mulf %17, %18 : vector<64x128xf32>
    %c0_15 = arith.constant 0 : index
    %c1 = arith.constant 1 : index
    %c0_16 = arith.constant 0 : index
    %20 = vector.load %arg6[%c0_15, %c1, %c0_16] : memref<1x8x128xf32, #tpu.memory_space<vmem>>, vector<1x1x128xf32>
    %21 = vector.shape_cast %20 : vector<1x1x128xf32> to vector<1x128xf32>
    %22 = vector.extract_strided_slice %19 {offsets = [0, 0], sizes = [32, 128], strides = [1, 1]} : vector<64x128xf32> to vector<32x128xf32>
    %cst_17 = arith.constant dense<0.000000e+00> : vector<128xf32>
    %23 = vector.multi_reduction <add>, %22, %cst_17 [0] : vector<32x128xf32> to vector<128xf32>
    %24 = vector.shape_cast %23 : vector<128xf32> to vector<1x128xf32>
    %25 = arith.addf %21, %24 : vector<1x128xf32>
    %c0_18 = arith.constant 0 : index
    %c1_19 = arith.constant 1 : index
    %c0_20 = arith.constant 0 : index
    %26 = vector.load %arg6[%c0_18, %c1_19, %c0_20] : memref<1x8x128xf32, #tpu.memory_space<vmem>>, vector<1x1x128xf32>
    %27 = vector.shape_cast %26 : vector<1x1x128xf32> to vector<1x128xf32>
    %28 = vector.shape_cast %25 : vector<1x128xf32> to vector<1x1x128xf32>
    tpu.vector_store %arg6[%c0_18, %c1_19, %c0_20], %28 {strides = array<i32>} : memref<1x8x128xf32, #tpu.memory_space<vmem>>, vector<1x1x128xf32>,
    %c0_21 = arith.constant 0 : index
    %c2 = arith.constant 2 : index
    %c0_22 = arith.constant 0 : index
    %29 = vector.load %arg6[%c0_21, %c2, %c0_22] : memref<1x8x128xf32, #tpu.memory_space<vmem>>, vector<1x1x128xf32>
    %30 = vector.shape_cast %29 : vector<1x1x128xf32> to vector<1x128xf32>
    %31 = vector.extract_strided_slice %19 {offsets = [32, 0], sizes = [32, 128], strides = [1, 1]} : vector<64x128xf32> to vector<32x128xf32>
    %cst_23 = arith.constant dense<0.000000e+00> : vector<128xf32>
    %32 = vector.multi_reduction <add>, %31, %cst_23 [0] : vector<32x128xf32> to vector<128xf32>
    %33 = vector.shape_cast %32 : vector<128xf32> to vector<1x128xf32>
    %34 = arith.addf %30, %33 : vector<1x128xf32>
    %c0_24 = arith.constant 0 : index
    %c2_25 = arith.constant 2 : index
    %c0_26 = arith.constant 0 : index
    %35 = vector.load %arg6[%c0_24, %c2_25, %c0_26] : memref<1x8x128xf32, #tpu.memory_space<vmem>>, vector<1x1x128xf32>
    %36 = vector.shape_cast %35 : vector<1x1x128xf32> to vector<1x128xf32>
    %37 = vector.shape_cast %34 : vector<1x128xf32> to vector<1x1x128xf32>
    tpu.vector_store %arg6[%c0_24, %c2_25, %c0_26], %37 {strides = array<i32>} : memref<1x8x128xf32, #tpu.memory_space<vmem>>, vector<1x1x128xf32>,
    return
  }
  func.func @transform_0(%arg0: i32, %arg1: i32) -> (i32, i32) {
    %c2_i32 = arith.constant 2 : i32
    %0 = arith.muli %arg0, %c2_i32 : i32
    %1 = arith.addi %0, %arg1 : i32
    %c3_i32 = arith.constant 3 : i32
    %2 = arith.minsi %1, %c3_i32 : i32
    %c0_i32 = arith.constant 0 : i32
    %c0_i32_0 = arith.constant 0 : i32
    return %2, %c0_i32 : i32, i32
  }
  func.func @transform_1(%arg0: i32, %arg1: i32) -> (i32, i32) {
    %c2_i32 = arith.constant 2 : i32
    %0 = arith.muli %arg0, %c2_i32 : i32
    %1 = arith.addi %0, %arg1 : i32
    %c3_i32 = arith.constant 3 : i32
    %2 = arith.minsi %1, %c3_i32 : i32
    %c0_i32 = arith.constant 0 : i32
    %c0_i32_0 = arith.constant 0 : i32
    return %2, %c0_i32 : i32, i32
  }
  func.func @transform_2(%arg0: i32, %arg1: i32) -> (i32, i32) {
    %c2_i32 = arith.constant 2 : i32
    %0 = arith.muli %arg0, %c2_i32 : i32
    %1 = arith.addi %0, %arg1 : i32
    %c3_i32 = arith.constant 3 : i32
    %2 = arith.minsi %1, %c3_i32 : i32
    %c0_i32 = arith.constant 0 : i32
    %c0_i32_0 = arith.constant 0 : i32
    return %c0_i32, %2 : i32, i32
  }
  func.func @transform_3(%arg0: i32, %arg1: i32) -> (i32, i32) {
    %c0_i32 = arith.constant 0 : i32
    %c0_i32_0 = arith.constant 0 : i32
    %c0_i32_1 = arith.constant 0 : i32
    return %c0_i32, %c0_i32_0 : i32, i32
  }
  func.func @transform_4(%arg0: i32, %arg1: i32) -> (i32, i32, i32) {
    %c0_i32 = arith.constant 0 : i32
    %c0_i32_0 = arith.constant 0 : i32
    %c0_i32_1 = arith.constant 0 : i32
    return %arg0, %c0_i32, %c0_i32_0 : i32, i32, i32
  }
}

</mosaic_0001>

<bundles_post_ra>
// kernel: tpu_custom_call.1
= control target key start
LH: loop header
LB: loop body
LE: loop exit
PB: predicated region body
PF: predicated region fallthrough
CT: control target
= control target key end

     0   :  { %s1637_s0 = inlined_call_operand.hbm [shape: f32[512,128], index: 0, kind: input, shape index: {}]   ;;  %s1638_s1 = inlined_call_operand.hbm [shape: f32[512,128], index: 1, kind: input, shape index: {}]   ;;  %s1639_s2 = inlined_call_operand.hbm [shape: bf16[64,512], index: 2, kind: input, shape index: {}]   ;;  %s1640_s3 = inlined_call_operand.hbm [shape: f32[64,128], index: 3, kind: input, shape index: {}]   ;;  %s1641_s4 = inlined_call_operand.hbm [shape: f32[2,8,128], index: 4, kind: output, shape index: {}]  }
   0x1   :  { %1657 = sst [smem:[#allocation25_spill]] %s1638_s1 }
   0x2   :  { %9 = vsyncpa [#allocation3], 0 }
   0x3   :  { %11 = vsyncpa [#allocation3 + $0x1], 0 }
   0x4   :  { %12 = vsyncpa [#allocation6], 0 }
   0x5   :  { %14 = vsyncpa [#allocation6 + $0x1], 0 }
   0x6   :  { %15 = vsyncpa [#allocation9], 0 }
   0x7   :  { %16 = vsyncpa [#allocation4], 0 }
   0x8   :  { %18 = vsyncpa [#allocation4 + $0x1], 0  ;;  %s1256_s15 = smov 0   ;;  %s1258_s16 = smov 0  }
   0x9   :  { %s1260_s17 = smov 0   ;;  %s1262_s18 = smov 0  }
   0xa   :  { %s1264_s19 = smov 0   ;;  %s1266_s20 = smov 0  }
   0xb   :  { %s1268_s21 = smov 0   ;;  %s1270_s22 = smov 0  }
   0xc   :  { %s1272_s23 = smov 0   ;;  %s1274_s24 = smov 0  }
   0xd   :  { %s1276_s25 = smov 0  }
   0xe LB: > { %1658 = sst [smem:[#allocation15_spill]] %s1178_s15  ;;  %s33_s26 = sadd.s32 1, %s1210_s23  ;;  %s1218_s25 = sphi %s1276_s25, %s24_s25   ;;  %s1214_s24 = sphi %s1274_s24, %s1693_s24   ;;  %s1210_s23 = sphi %s1272_s23, %s1692_s23   ;;  %s1206_s22 = sphi %s1270_s22, %s1691_s22   ;;  %s1202_s21 = sphi %s1268_s21, %s1690_s21   ;;  %s1198_s20 = sphi %s1266_s20, %s1689_s20   ;;  %s1194_s19 = sphi %s1264_s19, %s1697_s19   ;;  %s1190_s18 = sphi %s1262_s18, %s1696_s18   ;;  %s1186_s17 = sphi %s1260_s17, %s1687_s17   ;;  %s1182_s16 = sphi %s1258_s16, %s1695_s16   ;;  %s1178_s15 = sphi %s1256_s15, %s1694_s15  }
   0xf   : > { %1659 = sst [smem:[#allocation16_spill]] %s1186_s17  ;;  %s36_s27 = sadd.s32 1, %s1214_s24 }
  0x10   : > { %1660 = sst [smem:[#allocation17_spill]] %s1198_s20  ;;  %p34_p0 = scmp.ge.s32.totalorder %s33_s26, 2 }
  0x11   : > { %1661 = sst [smem:[#allocation18_spill]] %s1210_s23  ;;  %s758_s28 = sshll.u32 %s1214_s24, 1 }
  0x12   : > { %1662 = sst [smem:[#allocation19_spill]] %s1214_s24  ;;  %s41_s29 = sadd.s32 %s1210_s23, %s758_s28 }
  0x13   : > { %s51_s30 = sadd.s32 1, %s1198_s20  ;;  %s1699_s26 = smov (%p34_p0, %s33_s26), 0 }
  0x14   : > { %1663 = sst [smem:[#allocation20_spill]] %s1699_s26  ;;  %s1701_s27 = smov (!%p34_p0, %s36_s27), %s1214_s24 }
  0x15   : > { %p42_p1 = scmp.lt.s32.totalorder %s41_s29, 3  ;;  %p58_p2 = scmp.ne.s32.totalorder %s1198_s20, %s1194_s19 }
  0x16   : > { %p38_p3 = scmp.ge.s32.totalorder %s1701_s27, 2  ;;  %p59_p4 = scmp.eq.s32.totalorder %s1218_s25, 0 }
  0x17   : > { %s1703_s29 = smov (!%p42_p1, %s41_s29), 3  ;;  %p878_p8 = scmp.lt.s32.totalorder %s1218_s25, 4 }
  0x18   : > { %s1705_s27 = smov (%p38_p3, %s1701_s27), 0  ;;  %p1326_p5 = por %p59_p4, %p58_p2 }
  0x19   : > { %1664 = sst [smem:[#allocation21_spill]] %s1705_s27  ;;  %s759_s6 = sshll.u32 %s1705_s27, 1 }
  0x1a   : > { %s163_s7 = ssub.s32 %s1214_s24, %s1705_s27  ;;  %s45_s8 = sadd.s32 %s759_s6, %s1699_s26 }
  0x1b   : > { %p1334_p6 = scmp.eq.s32.totalorder %s163_s7, 0  ;;  %p46_p7 = scmp.lt.s32.totalorder %s45_s8, 3 }
  0x1c   : > { %s1340_s10 = sand.u32 1, %s1198_s20   ;;  %s793_s11 = sshll.u32 %s1703_s29, 11 }
  0x1d   : > { %s1707_s8 = smov (!%p46_p7, %s45_s8), 3  ;;  %s1646_s13 = sshll.u32 %s1340_s10, 7 }
  0x1e   : > { %s48_s12 = ssub.s32 %s1703_s29, %s1707_s8  ;;  %p1347_p10 = pnand %p878_p8, %p1326_p5 }
  0x1f   : > { %p49_p9 = scmp.eq.s32.totalorder %s48_s12, 0  ;;  %s241_s28 = sand.u32 1, %s1218_s25  }
  0x20   : > { %s1669_s1 = sld [smem:[#allocation25_spill]]  ;;  %s245_s24 = scalar_lea.vmem [#allocation5], %s1646_s13 }
  0x21   : > { %s1353_s6 = scalar_select %p49_p9, %s1198_s20, %s51_s30  }
  0x22   : > { %s256_s8 = sshll.u32 %s245_s24, 4  ;;  %s775_s12 = sshll.u32 %s1340_s10, 5  ;;  %s257_s8 = int_to_ptr.vmem [resolvable:$true] %s256_s8 }
  0x23   : > { %1668 = sst [smem:[#allocation22_spill]] %s1353_s6  ;;  %s1363_s5 = scalar_lea.sflag [#allocation6], %s241_s28 }
  0x24   : > { %p1656_p11 = pneg %p1347_p10  ;;  %s993_s23 = scalar_lea.vmem %s257_s8, 2048 }
  0x25   : > { %p994_p12 = scmp.ne.s32.totalorder %s257_s8, %s993_s23  ;;  %s1220_s30 = smov [#allocation5]  }
  0x26   : > { %s255_s26 = scalar_lea.hbm %s1669_s1, %s793_s11  ;;  %s998_s6 = sshll.u32 %s1220_s30, 4  ;;  %s999_s6 = int_to_ptr.vmem [resolvable:$false] %s998_s6 }
  0x27   : > { %p996_p13 = pnand %p994_p12, %p1656_p11  ;;  %s1000_s27 = scalar_lea.vmem %s999_s6, 4096 }
  0x28   : > { %p1001_p1 = scmp.lt.s32.totalorder %s257_s8, %s999_s6  ;;  %p1002_p2 = scmp.lt.s32.totalorder %s1000_s27, %s993_s23 }
  0x29   : > { %p997_p0 = pneg %p996_p13 }
  0x2a   : > { %p1003_p3 = por %p1002_p2, %p1001_p1 }
  0x2c   : > { %p1004_p4 = pnand %p1003_p3, %p997_p0 }
  0x2e   : > { %1007 = shalt.err (!%p1004_p4)
}
  0x2f   : > { %s1647_s24 = smov 128   ;;  %s1649_s28 = smov 8  }
  0x30   : > { %869 = dma.hbm_to_vmem [thread:$0]  (!%p1347_p10), %s255_s26, 2048, %s257_s8, %s1363_s5, %s1647_s24, %s1647_s24, %s1649_s28  }
  0x31   : > { %s270_s23 = scalar_lea.vmem [#allocation7], %s775_s12  ;;  %s1379_s7 = sadd.s32 4294967295, %s1218_s25  }
  0x32   : > { %s280_s6 = sshll.u32 %s270_s23, 4  ;;  %s757_s30 = sadd.s32 4294967294, %s1218_s25   ;;  %s1376_s6 = int_to_ptr.vmem [resolvable:$true] %s280_s6 }
  0x33   : > { %p64_p5 = scmp.ne.s32.totalorder %s1194_s19, %s1190_s18  ;;  %p1655_p7 = scmp.eq.s32.totalorder %s1379_s7, 0 }
  0x34   : > { %s166_s27 = sadd.s32 1, %s1186_s17  ;;  %p176_p9 = scmp.ne.s32.totalorder %s1186_s17, %s1182_s16 }
  0x35   : > { %s1389_s13 = scalar_select %p1334_p6, %s1186_s17, %s166_s27  }
  0x36   : > { %p1393_p8 = por %p1655_p7, %p64_p5  ;;  %p177_p12 = scmp.eq.s32.totalorder %s1379_s7, 3 }
  0x37   : > { %1670 = sst [smem:[#allocation23_spill]] %s1389_s13  ;;  %p182_p13 = scmp.ne.s32.totalorder %s1182_s16, %s1178_s15 }
  0x38   : > { %p183_p0 = scmp.eq.s32.totalorder %s757_s30, 3  ;;  %p764_p1 = scmp.ge.s32.totalorder %s1218_s25, 1 }
  0x39   : > { %p1403_p2 = por %p177_p12, %p176_p9  ;;  %p190_p3 = scmp.lt.s32.totalorder %s1218_s25, 5 }
  0x3a   : > { %p1408_p6 = por %p183_p0, %p182_p13  ;;  %s1223_s12 = smov [#allocation8]  }
  0x3b   : > { %p1412_p4 = pnand %p764_p1, %p190_p3  ;;  %s202_s23 = sshll.u32 %s1223_s12, 4  ;;  %s203_s23 = int_to_ptr.vmem [resolvable:$true] %s202_s23 }
  0x3c   : > { %s1673_s9 = scalar_select %p1408_p6, 1, 0 }
  0x3d   : > { %p859_p5 = pneg %p1412_p4  ;;  %s1423_s24 = scalar_lea.hbm %s1637_s0, %s793_s11 }
  0x3e   : > { %1674 = sst [smem:[#allocation24_spill]] %s1673_s9  ;;  %s1677_s1 = sshll.u32 %s1340_s10, 7 }
  0x3f   : > { %p1427_p9 = pnand %p859_p5, %p1655_p7  ;;  %s220_s20 = scalar_lea.vmem [#allocation2], %s1677_s1 }
  0x40   : > { %s231_s13 = sshll.u32 %s220_s20, 4  ;;  %s777_s12 = sshll.u32 %s1703_s29, 6  ;;  %s1433_s13 = int_to_ptr.vmem [resolvable:$true] %s231_s13 }
  0x41   : > { %s1439_s15 = scalar_lea.hbm %s1639_s2, %s777_s12  ;;  %p1010_p12 = pneg %p1427_p9 }
  0x42   : > { %s1019_s11 = scalar_lea.vmem %s203_s23, 1024  ;;  %p1027_p3 = scmp.lt.s32.totalorder %s203_s23, %s203_s23 }
  0x43   : > { %p1020_p13 = scmp.ne.s32.totalorder %s203_s23, %s1019_s11  ;;  %p1028_p5 = scmp.lt.s32.totalorder %s1019_s11, %s1019_s11 }
  0x45   : > { %p1022_p0 = pnand %p1020_p13, %p1010_p12  ;;  %p1029_p7 = por %p1028_p5, %p1027_p3 }
  0x47   : > { %p1023_p1 = pneg %p1022_p0 }
  0x49   : > { %p1030_p11 = pnand %p1029_p7, %p1023_p1 }
  0x4b   : > { %1033 = shalt.err (!%p1030_p11)
}
  0x4c   : > { %s1678_s1 = smov 8   ;;  %s1679_s20 = smov 128  }
  0x4d   : > { %862 = dma.hbm_to_vmem [thread:$0]  (!%p1427_p9), %s1640_s3, 1024, %s203_s23, [#allocation9], %s1679_s20, %s1679_s20, %s1678_s1  }
  0x4e   : > { %s217_s9 = scalar_lea.sflag [#allocation3], %s1340_s10  ;;  %s1047_s30 = scalar_lea.vmem %s1433_s13, 2048 }
  0x4f   : > { %p1048_p12 = scmp.ne.s32.totalorder %s1433_s13, %s1047_s30  ;;  %p1680_p7 = pneg %p1347_p10 }
  0x50   : > { %s1224_s28 = smov [#allocation2]  }
  0x51   : > { %p1050_p11 = pnand %p1048_p12, %p1680_p7  ;;  %s1052_s27 = sshll.u32 %s1224_s28, 4  ;;  %s1053_s27 = int_to_ptr.vmem [resolvable:$false] %s1052_s27 }
  0x52   : > { %s1054_s12 = scalar_lea.vmem %s1053_s27, 4096  ;;  %p1055_p0 = scmp.lt.s32.totalorder %s1433_s13, %s1053_s27 }
  0x53   : > { %p1051_p13 = pneg %p1050_p11  ;;  %p1056_p1 = scmp.lt.s32.totalorder %s1054_s12, %s1047_s30 }
  0x55   : > { %p1057_p3 = por %p1056_p1, %p1055_p0 }
  0x57   : > { %p1058_p5 = pnand %p1057_p3, %p1051_p13 }
  0x59   : > { %1061 = shalt.err (!%p1058_p5)
}
  0x5a   : > { %866 = dma.hbm_to_vmem [thread:$0]  (!%p1347_p10), %s1423_s24, 2048, %s1433_s13, %s217_s9, %s1679_s20, %s1679_s20, %s1678_s1  }
  0x5b   : > { %s1075_s10 = scalar_lea.vmem %s1376_s6, 512  ;;  %p1681_p12 = pmov %p1680_p7 }
  0x5c   : > { %p1076_p9 = scmp.ne.s32.totalorder %s1376_s6, %s1075_s10  ;;  %s1225_s23 = smov [#allocation7]  }
  0x5d   : > { %s1080_s11 = sshll.u32 %s1225_s23, 4  ;;  %s1081_s11 = int_to_ptr.vmem [resolvable:$false] %s1080_s11 }
  0x5e   : > { %p1078_p7 = pnand %p1076_p9, %p1681_p12  ;;  %s1082_s29 = scalar_lea.vmem %s1081_s11, 1024 }
  0x5f   : > { %p1083_p13 = scmp.lt.s32.totalorder %s1376_s6, %s1081_s11  ;;  %p1084_p0 = scmp.lt.s32.totalorder %s1082_s29, %s1075_s10 }
  0x60   : > { %p1079_p11 = pneg %p1078_p7 }
  0x61   : > { %p1085_p1 = por %p1084_p0, %p1083_p13 }
  0x63   : > { %p1086_p3 = pnand %p1085_p1, %p1079_p11 }
  0x65   : > { %1089 = shalt.err (!%p1086_p3)
}
  0x66   : > { %s1226_s17 = smov 256   ;;  %s1227_s13 = smov 64  }
  0x67   : > { %s1228_s24 = smov 4   ;;  %292 = sbr.rel (%p1412_p4) target bundleno = 393 (0x189), region = 36 }
  0x68   : > { %872 = dma.hbm_to_vmem [thread:$0]  (!%p1347_p10), %s1439_s15, 512, %s1376_s6, %s1363_s5, %s1226_s17, %s1227_s13, %s1228_s24  }
  0x69   : > { %s294_s1 = sand.u32 (!%p1412_p4), 1, %s1194_s19  }
  0x6a   : > { %s779_s20 = sshll.u32 (!%p1412_p4), %s294_s1, 7  ;;  %s295_s9 = scalar_lea.sflag (!%p1412_p4), [#allocation3], %s294_s1 }
  0x6b   : > { %s1479_s30 = scalar_lea.vmem (!%p1412_p4), [#allocation2], %s779_s20 }
  0x6c   : > { %1161 = dma.done.wait (%p1393_p8), %s295_s9, 2048  }
  0x6d   : > { %1163 = vsyncadd (%p1393_p8), %s295_s9, 4294965248  ;;  %s303_s28 = sand.u32 1, %s1379_s7   ;;  %s1486_s15 = scalar_lea.vmem [#allocation5], %s779_s20 }
  0x6e   : > { %s304_s14 = scalar_lea.sflag [#allocation6], %s303_s28 }
  0x6f   : > { %1165 = dma.done.wait (%p1393_p8), %s304_s14, 2560  }
  0x70   : > { %1167 = vsyncadd (%p1393_p8), %s304_s14, 4294964736  ;;  %s781_s5 = sshll.u32 %s294_s1, 5  ;;  %p1682_p10 = scmp.eq.s32.totalorder %s1379_s7, 0 }
  0x71   : > { %s1492_s6 = scalar_lea.vmem [#allocation7], %s781_s5 }
  0x72   : > { %1169 = dma.done.wait (%p1682_p10), [#allocation9], 1024   ;;  %p1683_p4 = pmov %p1682_p10 }
  0x73   : > { %s352_s8 = sand.u32 1, %s1182_s16   ;;  %p784_p5 = scmp.ne.s32.totalorder %s1202_s21, 0 }
  0x74   : > { %1171 = vsyncadd (%p1683_p4), [#allocation9], 4294966272  ;;  %s783_s27 = sshll.u32 %s352_s8, 3 }
  0x75   : > { %s1501_s12 = scalar_lea.vmem [#allocation10], %s783_s27  ;;  %373 = sbr.rel (%p784_p5) target bundleno = 124 (0x7c), region = 56 }
  0x7a   : > { %v1229_v0 = vmov 0.0  }
  0x7b   : > { %374 = vst [vmem:[%s1501_s12] sm:$0xff] %v1229_v0 }
  0x7c PF: > { %v1506_v1 = vld [vmem:[%s1479_s30 + $0x70] sm:$0xff]  ;;  %v1509_v2 = vld [vmem:[%s1479_s30 + $0x78] sm:$0xff]  ;;  %v1514_v4 = vld [vmem:[%s1479_s30 + $0x60] sm:$0xff]  ;;  %s790_s21 = sshll.u32 %s1206_s22, 7  ;;  %s622_s7 = sshll.u32 %s1501_s12, 4  ;;  %s623_s7 = int_to_ptr.vmem [resolvable:$true] %s622_s7 }
  0x7d   : > { %v478_v3 = vpack.c.bf16 %v1509_v2, %v1506_v1  ;;  %v1517_v5 = vld [vmem:[%s1479_s30 + $0x68] sm:$0xff]  ;;  %v1522_v7 = vld [vmem:[%s1479_s30 + $0x50] sm:$0xff]  ;;  %v1525_v8 = vld [vmem:[%s1479_s30 + $0x58] sm:$0xff]  ;;  %s1578_s23 = scalar_lea.hbm %s1641_s4, %s790_s21  ;;  %s609_s11 = scalar_lea.sflag [#allocation4], %s352_s8 }
  0x7e   : > { %v477_v6 = vpack.c.bf16 %v1517_v5, %v1514_v4  ;;  %v476_v9 = vpack.c.bf16 %v1525_v8, %v1522_v7  ;;  %v383_v10 = vld [vmem:[%s1479_s30 + $0x40] sm:$0xff]  ;;  %v1531_v11 = vld [vmem:[%s1479_s30 + $0x48] sm:$0xff]  ;;  %v381_v12 = vld [vmem:[%s1479_s30 + $0x30] sm:$0xff]  ;;  %s1090_s29 = scalar_lea.vmem %s623_s7, 128  ;;  %s1230_s22 = smov [#allocation10]  }
  0x7f   : > { %807 = vmatprep.subr.bf16.mxu0 %v478_v3  ;;  %831 = vmatprep.subr.bf16.mxu1 %v478_v3  ;;  %v382_v13 = vld [vmem:[%s1479_s30 + $0x38] sm:$0xff]  ;;  %v395_v14 = vld [vmem:[%s1486_s15 + $0x20] sm:$0xff]  ;;  %v377_v15 = vld [vmem:[%s1479_s30 + $0x10] sm:$0xff]  ;;  %v475_v18 = vpack.c.bf16 %v1531_v11, %v383_v10  ;;  %p1091_p8 = scmp.ne.s32.totalorder %s623_s7, %s1090_s29  ;;  %s1094_s17 = sshll.u32 %s1230_s22, 4  ;;  %s1095_s17 = int_to_ptr.vmem [resolvable:$false] %s1094_s17 }
  0x80   : > { %808 = vmatpush3.bf16.msra.mxu0 %v478_v3  ;;  %839 = vmatpush3.bf16.msra.mxu1 %v478_v3  ;;  %v378_v16 = vld [vmem:[%s1479_s30 + $0x18] sm:$0xff]  ;;  %v393_v17 = vld [vmem:[%s1486_s15 + $0x10] sm:$0xff]  ;;  %v379_v19 = vld [vmem:[%s1479_s30 + $0x20] sm:$0xff]  ;;  %v474_v31 = vpack.c.bf16 %v382_v13, %v381_v12  ;;  %s1096_s13 = scalar_lea.vmem %s1095_s17, 256  ;;  %p1097_p7 = scmp.lt.s32.totalorder %s623_s7, %s1095_s17 }
  0x81   : > { %809 = vmatprep.subr.bf16.mxu0 %v477_v6  ;;  %832 = vmatprep.subr.bf16.mxu1 %v477_v6  ;;  %v394_v20 = vld [vmem:[%s1486_s15 + $0x18] sm:$0xff]  ;;  %v375_v21 = vld [vmem:[%s1479_s30] sm:$0xff]  ;;  %v376_v22 = vld [vmem:[%s1479_s30 + $0x8] sm:$0xff]  ;;  %v409_v24 = vsub.f32 %v377_v15, %v393_v17  ;;  %v411_v32 = vsub.f32 %v379_v19, %v395_v14  ;;  %v472_v54 = vpack.c.bf16 %v378_v16, %v377_v15  ;;  %p1092_p9 = pnand %p1091_p8, %p1403_p2  ;;  %p1098_p11 = scmp.lt.s32.totalorder %s1096_s13, %s1090_s29 }
  0x82   : > { %v396_v23 = vld [vmem:[%s1486_s15 + $0x28] sm:$0xff]  ;;  %v391_v25 = vld [vmem:[%s1486_s15] sm:$0xff]  ;;  %v410_v27 = vsub.f32 %v378_v16, %v394_v20  ;;  %v977_v33 = vld [vmem:[%s1492_s6 + $0x10] sm:$0xff]   ;;  %v471_v61 = vpack.c.bf16 %v376_v22, %v375_v21 }
  0x83   : > { %v392_v26 = vld [vmem:[%s1486_s15 + $0x8] sm:$0xff]  ;;  %v407_v28 = vsub.f32 %v375_v21, %v391_v25  ;;  %v976_v30 = vld [vmem:[%s1492_s6] sm:$0xff]   ;;  %v397_v34 = vld [vmem:[%s1486_s15 + $0x30] sm:$0xff]  ;;  %v426_v35 = vmul.f32 %v409_v24, %v409_v24  ;;  %827 = vmatprep.mubr.bf16.mxu1 %v977_v33  ;;  %v428_v45 = vmul.f32 %v411_v32, %v411_v32  ;;  %p1093_p12 = pneg %p1092_p9  ;;  %p1099_p13 = por %p1098_p11, %p1097_p7 }
  0x84   : > { %810 = vmatpush3.bf16.msra.mxu0 %v477_v6  ;;  %840 = vmatpush3.bf16.msra.mxu1 %v477_v6  ;;  %v408_v29 = vsub.f32 %v376_v22, %v392_v26  ;;  %v380_v38 = vld [vmem:[%s1479_s30 + $0x28] sm:$0xff]  ;;  %v427_v40 = vmul.f32 %v410_v27, %v410_v27  ;;  %v398_v42 = vld [vmem:[%s1486_s15 + $0x38] sm:$0xff]  ;;  %v413_v43 = vsub.f32 %v381_v12, %v397_v34  ;;  %v399_v44 = vld [vmem:[%s1486_s15 + $0x40] sm:$0xff] }
  0x85   : > { %811 = vmatprep.subr.bf16.mxu0 %v476_v9  ;;  %833 = vmatprep.subr.bf16.mxu1 %v476_v9  ;;  %v424_v36 = vmul.f32 %v407_v28, %v407_v28  ;;  %v412_v39 = vsub.f32 %v380_v38, %v396_v23  ;;  %v473_v46 = vpack.c.bf16 %v380_v38, %v379_v19  ;;  %v400_v51 = vld [vmem:[%s1486_s15 + $0x48] sm:$0xff]  ;;  %v406_v21 = vld [vmem:[%s1486_s15 + $0x78] sm:$0xff]  ;;  %p1100_p0 = pnand %p1099_p13, %p1093_p12 }
  0x86   : > { %v425_v37 = vmul.f32 %v408_v29, %v408_v29  ;;  %823 = vmatprep.mubr.bf16.mxu0 %v976_v30  ;;  %v414_v48 = vsub.f32 %v382_v13, %v398_v42  ;;  %v415_v52 = vsub.f32 %v383_v10, %v399_v44  ;;  %v430_v53 = vmul.f32 %v413_v43, %v413_v43  ;;  %v978_v6 = vld [vmem:[%s1492_s6 + $0x8] sm:$0xff]   ;;  %v401_v10 = vld [vmem:[%s1486_s15 + $0x50] sm:$0xff]  ;;  %v403_v13 = vld [vmem:[%s1486_s15 + $0x60] sm:$0xff] }
  0x87   : > { %v429_v49 = vmul.f32 %v412_v39, %v412_v39  ;;  %v416_v56 = vsub.f32 %v1531_v11, %v400_v51  ;;  %v402_v11 = vld [vmem:[%s1486_s15 + $0x58] sm:$0xff]  ;;  %v417_v12 = vsub.f32 %v1522_v7, %v401_v10  ;;  %v404_v15 = vld [vmem:[%s1486_s15 + $0x68] sm:$0xff]  ;;  %v419_v16 = vsub.f32 %v1514_v4, %v403_v13 }
  0x88   : > { %812 = vmatpush3.bf16.msra.mxu0 %v476_v9  ;;  %841 = vmatpush3.bf16.msra.mxu1 %v476_v9  ;;  %v440_v41 = vadd.f32 %v425_v37, %v424_v36  ;;  %v431_v57 = vmul.f32 %v414_v48, %v414_v48  ;;  %v432_v59 = vmul.f32 %v415_v52, %v415_v52  ;;  %v979_v9 = vld [vmem:[%s1492_s6 + $0x18] sm:$0xff]   ;;  %v569_v44 = vld [vmem:[#allocation8 + $0x8] sm:$0xff] }
  0x89   : > { %813 = vmatprep.subr.bf16.mxu0 %v475_v18  ;;  %834 = vmatprep.subr.bf16.mxu1 %v475_v18  ;;  %v433_v62 = vmul.f32 %v416_v56, %v416_v56  ;;  %v418_v14 = vsub.f32 %v1525_v8, %v402_v11  ;;  %v434_v17 = vmul.f32 %v417_v12, %v417_v12 }
  0x8a   : > { %v441_v47 = vadd.f32 %v440_v41, %v426_v35  ;;  %v420_v19 = vsub.f32 %v1517_v5, %v404_v15  ;;  %v436_v23 = vmul.f32 %v419_v16, %v419_v16  ;;  %v422_v25 = vsub.f32 %v1509_v2, %v406_v21  ;;  %v572_v41 = vld [vmem:[#allocation8 + $0x20] sm:$0xff] }
  0x8b   : > { %v435_v20 = vmul.f32 %v418_v14, %v418_v14 }
  0x8c   : > { %814 = vmatpush3.bf16.msra.mxu0 %v475_v18  ;;  %842 = vmatpush3.bf16.msra.mxu1 %v475_v18  ;;  %v442_v50 = vadd.f32 %v441_v47, %v427_v40  ;;  %v405_v18 = vld [vmem:[%s1486_s15 + $0x70] sm:$0xff]  ;;  %v437_v7 = vmul.f32 %v420_v19, %v420_v19  ;;  %v439_v28 = vmul.f32 %v422_v25, %v422_v25  ;;  %v568_v40 = vld [vmem:[#allocation8] sm:$0xff] }
  0x8d   : > { %815 = vmatprep.subr.bf16.mxu0 %v474_v31  ;;  %835 = vmatprep.subr.bf16.mxu1 %v474_v31  ;;  %v421_v22 = vsub.f32 %v1506_v1, %v405_v18  ;;  %v423_v1 = vld [vmem:[%s1501_s12] sm:$0x1]  ;;  %v574_v47 = vld [vmem:[#allocation8 + $0x30] sm:$0xff]  ;;  %v584_v18 = vld [vmem:[%s1501_s12 + $0x1] sm:$0x1] }
  0x8e   : > { %v443_v55 = vadd.f32 %v442_v50, %v428_v45  ;;  %v573_v45 = vld [vmem:[#allocation8 + $0x28] sm:$0xff] }
  0x8f   : > { %v438_v8 = vmul.f32 %v421_v22, %v421_v22  ;;  %v596_v19 = vld [vmem:[%s1501_s12 + $0x2] sm:$0x1] }
  0x90   : > { %816 = vmatpush3.bf16.msra.mxu0 %v474_v31  ;;  %843 = vmatpush3.bf16.msra.mxu1 %v474_v31  ;;  %v444_v58 = vadd.f32 %v443_v55, %v429_v49  ;;  %v575_v55 = vld [vmem:[#allocation8 + $0x38] sm:$0xff] }
  0x91   : > { %817 = vmatprep.subr.bf16.mxu0 %v473_v46  ;;  %836 = vmatprep.subr.bf16.mxu1 %v473_v46 }
  0x92   : > { %v445_v60 = vadd.f32 %v444_v58, %v430_v53 }
  0x94   : > { %818 = vmatpush3.bf16.msra.mxu0 %v473_v46  ;;  %844 = vmatpush3.bf16.msra.mxu1 %v473_v46  ;;  %v446_v63 = vadd.f32 %v445_v60, %v431_v57  ;;  %v570_v46 = vld [vmem:[#allocation8 + $0x10] sm:$0xff] }
  0x95   : > { %819 = vmatprep.subr.bf16.mxu0 %v472_v54  ;;  %837 = vmatprep.subr.bf16.mxu1 %v472_v54 }
  0x96   : > { %v447_v0 = vadd.f32 %v446_v63, %v432_v59 }
  0x98   : > { %820 = vmatpush3.bf16.msra.mxu0 %v472_v54  ;;  %845 = vmatpush3.bf16.msra.mxu1 %v472_v54  ;;  %v448_v3 = vadd.f32 %v447_v0, %v433_v62  ;;  %v571_v54 = vld [vmem:[#allocation8 + $0x18] sm:$0xff] }
  0x99   : > { %821 = vmatprep.subr.bf16.mxu0 %v471_v61  ;;  %838 = vmatprep.subr.bf16.mxu1 %v471_v61 }
  0x9a   : > { %v449_v24 = vadd.f32 %v448_v3, %v434_v17 }
  0x9c   : > { %822 = vmatpush3.bf16.msra.mxu0 %v471_v61  ;;  %846 = vmatpush3.bf16.msra.mxu1 %v471_v61  ;;  %v450_v26 = vadd.f32 %v449_v24, %v435_v20 }
  0x9e   : > { %v451_v27 = vadd.f32 %v450_v26, %v436_v23 }
  0x9f   : > { %824 = vmatmul.mubr.bf16.vlgmr.msra.gmra.mxu0 %v978_v6  ;;  %828 = vmatmul.mubr.bf16.vlgmr.msra.gmra.mxu1 %v979_v9 }
  0xa0   : > { %v452_v4 = vadd.f32 %v451_v27, %v437_v7 }
  0xa2   : > { %v453_v29 = vadd.f32 %v452_v4, %v438_v8 }
  0xa4   : > { %v454_v30 = vadd.f32 %v453_v29, %v439_v28 }
  0xa6   : > { %v455_v31 = vrot.slane %v454_v30, 4 }
  0xa8   : > { %v456_v5 = vadd.f32 %v455_v31, %v454_v30 }
  0xaa   : > { %v457_v32 = vrot.slane %v456_v5, 2 }
  0xac   : > { %v458_v33 = vadd.f32 %v457_v32, %v456_v5 }
  0xae   : > { %v459_v34 = vrot.slane %v458_v33, 1 }
  0xb0   : > { %v460_v35 = vadd.f32 %v459_v34, %v458_v33 }
  0xb2   : > { %v461_v36 = vadd.f32 %v460_v35, %v423_v1 }
  0xb4   : > { %462 = vst [vmem:[%s1501_s12] sm:$0x1] %v461_v36 }
 0x15f   : > { %v825_v37 = vpop.f32.mrf.mxu0  ;;  %v829_v2 = vpop.f32.mrf.mxu1 }
 0x160   : > { %v578_v56 = vmul.f32 %v825_v37, %v570_v46  ;;  %v582_v57 = vmul.f32 %v829_v2, %v574_v47 }
 0x161   : > { %v537_v38 = vpop.f32.mrf.mxu0  ;;  %v553_v39 = vpop.f32.mrf.mxu1 }
 0x162   : > { %v576_v50 = vmul.f32 %v568_v40, %v537_v38  ;;  %v580_v51 = vmul.f32 %v572_v41, %v553_v39 }
 0x163   : > { %v826_v42 = vpop.f32.mrf.mxu0  ;;  %v830_v43 = vpop.f32.mrf.mxu1 }
 0x164   : > { %v579_v60 = vmul.f32 %v826_v42, %v571_v54  ;;  %v583_v61 = vmul.f32 %v830_v43, %v575_v55 }
 0x165   : > { %v540_v48 = vpop.f32.mrf.mxu0  ;;  %v556_v49 = vpop.f32.mrf.mxu1 }
 0x166   : > { %v577_v52 = vmul.f32 %v569_v44, %v540_v48  ;;  %v581_v53 = vmul.f32 %v573_v45, %v556_v49 }
 0x168   : > { %v585_v58 = vadd.f32 %v577_v52, %v576_v50  ;;  %v597_v59 = vadd.f32 %v581_v53, %v580_v51 }
 0x16a   : > { %v586_v62 = vadd.f32 %v585_v58, %v578_v56  ;;  %v598_v63 = vadd.f32 %v597_v59, %v582_v57 }
 0x16c   : > { %v587_v0 = vadd.f32 %v586_v62, %v579_v60  ;;  %v599_v3 = vadd.f32 %v598_v63, %v583_v61 }
 0x16e   : > { %v588_v6 = vrot.slane %v587_v0, 4  ;;  %v600_v9 = vrot.slane %v599_v3, 4 }
 0x170   : > { %v589_v10 = vadd.f32 %v588_v6, %v587_v0  ;;  %v601_v11 = vadd.f32 %v600_v9, %v599_v3 }
 0x172   : > { %v590_v12 = vrot.slane %v589_v10, 2  ;;  %v602_v13 = vrot.slane %v601_v11, 2 }
 0x174   : > { %v591_v14 = vadd.f32 %v590_v12, %v589_v10  ;;  %v603_v15 = vadd.f32 %v602_v13, %v601_v11 }
 0x176   : > { %v592_v16 = vrot.slane %v591_v14, 1  ;;  %v604_v17 = vrot.slane %v603_v15, 1 }
 0x178   : > { %v593_v20 = vadd.f32 %v592_v16, %v591_v14  ;;  %v605_v21 = vadd.f32 %v604_v17, %v603_v15 }
 0x17a   : > { %v594_v22 = vadd.f32 %v593_v20, %v584_v18  ;;  %v606_v23 = vadd.f32 %v605_v21, %v596_v19 }
 0x17c   : > { %595 = vst [vmem:[%s1501_s12 + $0x1] sm:$0x1] %v594_v22  ;;  %607 = vst [vmem:[%s1501_s12 + $0x2] sm:$0x1] %v606_v23 }
 0x17d   : > { %1103 = shalt.err (!%p1100_p0)
}
 0x17e   : > { %s1104_s24 = scalar_lea.hbm %s1578_s23, 128  ;;  %s1108_s9 = scalar_lea.hbm %s1641_s4, 256 }
 0x17f   : > { %p1105_p1 = scmp.ne.s32.totalorder %s1578_s23, %s1104_s24  ;;  %p1109_p4 = scmp.lt.s32.totalorder %s1578_s23, %s1641_s4 }
 0x180   : > { %p1110_p5 = scmp.lt.s32.totalorder %s1108_s9, %s1104_s24 }
 0x181   : > { %p1106_p3 = pnand %p1105_p1, %p1403_p2 }
 0x182   : > { %p1111_p8 = por %p1110_p5, %p1109_p4 }
 0x183   : > { %p1107_p10 = pneg %p1106_p3 }
 0x185   : > { %p1112_p9 = pnand %p1111_p8, %p1107_p10 }
 0x187   : > { %1115 = shalt.err (!%p1112_p9)
}
 0x188   : > { %857 = dma.vmem_to_hbm [thread:$0]  (%p1403_p2), %s623_s7, 128, %s1578_s23, %s609_s11  }
 0x189 PF: > { %s1684_s14 = sld [smem:[#allocation15_spill]]  ;;  %p880_p12 = scmp.ge.s32.totalorder %s1218_s25, 2 }
 0x18b   : > { %p874_p7 = pnand %p880_p12, %p1408_p6 }
 0x18d   : > { %p875_p11 = pneg %p874_p7 }
 0x18f   : > { %s634_s5 = sand.u32 1, %s1684_s14  }
 0x190   : > { %s635_s6 = scalar_lea.sflag [#allocation4], %s634_s5 }
 0x191   : > { %1173 = dma.done.wait (%p875_p11), %s635_s6, 128  }
 0x192   : > { %1175 = vsyncadd (%p875_p11), %s635_s6, 4294967168  ;;  %s24_s25 = sadd.s32 1, %s1218_s25   ;;  %s1686_s8 = sld [smem:[#allocation16_spill]] }
 0x193   : > { %p21_p13 = scmp.ge.s32.totalorder %s24_s25, 6   ;;  %s1687_s17 = sld [smem:[#allocation23_spill]] }
 0x194   : > { %s1688_s27 = sld [smem:[#allocation17_spill]]  ;;  %s1694_s15 = smov %s1182_s16 }
 0x195   : > { %s1689_s20 = sld [smem:[#allocation22_spill]]  ;;  %s1696_s18 = smov %s1194_s19 }
 0x196   : > { %s1690_s21 = sld [smem:[#allocation18_spill]]  ;;  %23 = sbr.rel (!%p21_p13) target bundleno = 14 (0xe), region = 113 }
 0x197   : > { %s1691_s22 = sld [smem:[#allocation19_spill]] }
 0x198   : > { %s1692_s23 = sld [smem:[#allocation20_spill]]  ;;  %s1695_s16 = smov %s1686_s8 }
 0x199   : > { %s1693_s24 = sld [smem:[#allocation21_spill]] }
 0x19a   : > { %s1697_s19 = smov %s1688_s27 }
 0x19b   :  { %640 = vsyncpa [#allocation3], 1 }
 0x19c   :  { %642 = vsyncpa [#allocation3 + $0x1], 1 }
 0x19d   :  { %643 = vsyncpa [#allocation6], 1 }
 0x19e   :  { %645 = vsyncpa [#allocation6 + $0x1], 1 }
 0x19f   :  { %646 = vsyncpa [#allocation9], 1 }
 0x1a0   :  { %647 = vsyncpa [#allocation4], 1 }
 0x1a1   :  { %649 = vsyncpa [#allocation4 + $0x1], 1 }

</bundles_post_ra>
